<compile_context>
chip_gen: v7x
topology: tpu7x:2x2x1
jax: 0.10.0
libtpu: 0.0.40
codegen_flags: <defaults>
</compile_context>

<pallas_src>
import jax
import jax.numpy as jnp
from jax.experimental import pallas as pl
from jax.experimental.pallas import tpu as pltpu


_MIN_BLOCKS = 4                       # >=4 grid steps when possible (v7x 2-TC megacore + overlap)
_VMEM_HEADROOM = 16 * 1024 * 1024     # leave for Mosaic internal scratch (v7x has only 64 MiB)
_VMEM_MARGIN = 8 * 1024 * 1024        # slack on top of our own tile bytes


def _round_up(x: int, m: int) -> int:
    return ((x + m - 1) // m) * m


def _vmem_capacity_bytes() -> int:
    """Physical VMEM of the current part; conservative (v7x-sized) fallback."""
    try:
        cap = getattr(pltpu.get_tpu_info(), "vmem_capacity_bytes", None)
        if cap:
            return int(cap)
    except Exception:
        pass
    return 64 * 1024 * 1024


def _edge_classifier_kernel(x_ref, w_ref, b_ref, o_ref):
    # x_ref: (tile_m, K) VMEM   w_ref: (K, C) VMEM   b_ref: (1,) SMEM f32
    # o_ref: (tile_m, C) VMEM
    # MXU-native orientation (K on LHS lanes / RHS sublanes): no transpose of
    # the big X tile is ever generated.  Epilogue (bias + sigmoid) in f32.
    logits = jnp.dot(x_ref[...], w_ref[...], preferred_element_type=jnp.float32)
    o_ref[...] = jax.nn.sigmoid(logits + b_ref[0]).astype(o_ref.dtype)


def _choose_tile_rows(n_rows, k, c, in_item, out_item, target_block_bytes, budget_bytes):
    """Rows per grid step: big in HBM bytes, fits VMEM, keeps >=_MIN_BLOCKS steps."""
    k_pad = _round_up(k, 128)
    c_pad = _round_up(c, 128)                       # output block is lane-padded in VMEM
    w_bytes = 2 * k_pad * c_pad * in_item           # (double-buffered) resident weight
    per_row = 2 * k_pad * in_item + 2 * c_pad * out_item
    max_rows = max((budget_bytes - w_bytes) // per_row, 8)
    target_rows = max(target_block_bytes // max(k * in_item, 1), 8)
    tile = int(min(target_rows, max_rows, n_rows))
    if n_rows >= _MIN_BLOCKS * 8:
        tile = min(tile, _round_up(-(-n_rows // _MIN_BLOCKS), 8))
    if tile >= n_rows:
        return n_rows                                # single / full block is always legal
    return max((tile // 8) * 8, 8)                   # sublane-aligned row tiles


def _linear_sigmoid(x2d, w_mat, bias_f32, tile_m, out_dtype):
    """sigmoid(x2d @ w_mat + b) streamed through a 1-D row-block grid."""
    m, k = x2d.shape
    c = w_mat.shape[1]
    in_item = jnp.dtype(x2d.dtype).itemsize
    out_item = jnp.dtype(out_dtype).itemsize
    n_blocks = -(-m // tile_m)

    k_pad = _round_up(k, 128)
    c_pad = _round_up(c, 128)
    need = (2 * tile_m * k_pad * in_item            # double-buffered input block
            + 2 * tile_m * c_pad * out_item         # double-buffered (lane-padded) output
            + 2 * k_pad * c_pad * in_item)          # weight
    physical = _vmem_capacity_bytes()
    vmem_limit = int(min(max(need + _VMEM_MARGIN, 32 * 1024 * 1024),
                         physical - _VMEM_HEADROOM))

    cost = pl.CostEstimate(
        flops=2 * m * k * c,
        transcendentals=m * c,
        bytes_accessed=m * k * in_item + m * c * out_item + k * c * in_item + 4,
    )

    return pl.pallas_call(
        _edge_classifier_kernel,
        out_shape=jax.ShapeDtypeStruct((m, c), out_dtype),
        grid_spec=pltpu.PrefetchScalarGridSpec(
            num_scalar_prefetch=0,
            grid=(n_blocks,),
            in_specs=[
                pl.BlockSpec((tile_m, k), lambda i: (i, 0)),        # streamed X rows
                pl.BlockSpec((k, c), lambda i: (0, 0)),             # tiny resident weight
                pl.BlockSpec(memory_space=pltpu.MemorySpace.SMEM),  # bias scalar
            ],
            out_specs=pl.BlockSpec((tile_m, c), lambda i: (i, 0)),
        ),
        compiler_params=pltpu.CompilerParams(
            dimension_semantics=("parallel",),
            vmem_limit_bytes=vmem_limit,
        ),
        cost_estimate=cost,
    )(x2d, w_mat, bias_f32)


def edge_classifier(edge_embeddings, weight, bias, *, target_block_bytes=8 * 1024 * 1024):
    """sigmoid(edge_embeddings @ weight.T + bias).

    edge_embeddings: (N, D); weight: (1, D) (nn.Linear layout); bias: (1,).
    Returns (N, 1) in edge_embeddings.dtype.
    """
    n, d = edge_embeddings.shape
    out_dtype = edge_embeddings.dtype
    in_item = jnp.dtype(edge_embeddings.dtype).itemsize
    out_item = jnp.dtype(out_dtype).itemsize

    w_vec = weight.reshape(d)
    b = bias.reshape(1).astype(jnp.float32)         # epilogue stays f32 on all gens

    physical = _vmem_capacity_bytes()
    budget = max(physical - _VMEM_HEADROOM - _VMEM_MARGIN, 16 * 1024 * 1024)

    if d <= 128 and 128 % d == 0:
        # ---- lane-packed path: 128//d edges per 128-lane vreg row ----
        pack = 128 // d
        n_main = (n // pack) * pack
        parts = []
        if n_main > 0:
            n_rows = n_main // pack
            # Contiguous prefix reshape; free when n % pack == 0.
            # TODO(synk): when n % pack != 0 this prefix slice may cost one extra
            # HBM copy before the kernel; negligible for typical edge counts.
            x_packed = edge_embeddings[:n_main].reshape(n_rows, pack * d)
            # Block-diagonal weight: W_pack[p*d + k, p] = w[k].
            eye = jnp.eye(pack, dtype=w_vec.dtype)
            w_pack = (eye[:, None, :] * w_vec[None, :, None]).reshape(pack * d, pack)
            w_pack = w_pack.astype(edge_embeddings.dtype)
            tile_rows = _choose_tile_rows(n_rows, pack * d, pack, in_item, out_item,
                                          target_block_bytes, budget)
            out_main = _linear_sigmoid(x_packed, w_pack, b, tile_rows, out_dtype)
            parts.append(out_main.reshape(n_main, 1))
        if n_main < n:
            # < pack leftover edges: trivial, handled outside the kernel.
            tail = edge_embeddings[n_main:].astype(jnp.float32)
            tail_logits = tail @ w_vec.astype(jnp.float32)[:, None] + b
            parts.append(jax.nn.sigmoid(tail_logits).astype(out_dtype))
        return parts[0] if len(parts) == 1 else jnp.concatenate(parts, axis=0)

    # ---- general path (D does not divide 128): plain (tile_m, D) blocks ----
    # Weight replicated to 8 identical columns -> ordinary (tile_m, 8) output
    # tile; output traffic is <= 8/D of the input so the masked store is moot.
    w_mat = jnp.broadcast_to(w_vec.reshape(d, 1), (d, 8)).astype(edge_embeddings.dtype)
    tile_m = _choose_tile_rows(n, d, 8, in_item, out_item, target_block_bytes, budget)
    out = _linear_sigmoid(edge_embeddings, w_mat, b, tile_m, out_dtype)
    return out[:, :1]


def reference(x, w, b):
    logits = jnp.dot(x, w.T, precision=jax.lax.Precision.HIGHEST) + b
    return jax.nn.sigmoid(logits)


if __name__ == "__main__":
    key = jax.random.PRNGKey(0)
    k_w, k_b, k_x1, k_x2, k_w2, k_b2, k_x3 = jax.random.split(key, 7)

    # Config matching the PyTorch module: node_embedding_dim=16 -> D=32.
    node_dim = 16
    d = 2 * node_dim
    bound = 1.0 / jnp.sqrt(jnp.float32(d))
    weight = jax.random.uniform(k_w, (1, d), jnp.float32, minval=-bound, maxval=bound)
    bias = jax.random.uniform(k_b, (1,), jnp.float32, minval=-bound, maxval=bound)

    # Case 1: small, single block (lane-packed path, 4 edges per vreg row).
    x1 = jax.random.normal(k_x1, (64, d), jnp.float32)
    out1 = jax.block_until_ready(edge_classifier(x1, weight, bias))
    ref1 = reference(x1, weight, bias)
    assert out1.shape == (64, 1)
    assert jnp.allclose(out1, ref1, atol=1e-5, rtol=1e-5)

    # Case 2: multi-block grid with a partial tail block, plus a 1-edge ragged
    # remainder (301 % 4 != 0) handled outside the kernel.
    x2 = jax.random.normal(k_x2, (301, d), jnp.float32)
    out2 = jax.block_until_ready(edge_classifier(x2, weight, bias))
    ref2 = reference(x2, weight, bias)
    assert out2.shape == (301, 1)
    assert jnp.allclose(out2, ref2, atol=1e-5, rtol=1e-5)

    # Case 3: D = 96 does not divide 128 -> general (non-packed) fallback path.
    node_dim3 = 48
    d3 = 2 * node_dim3
    bound3 = 1.0 / jnp.sqrt(jnp.float32(d3))
    weight3 = jax.random.uniform(k_w2, (1, d3), jnp.float32, minval=-bound3, maxval=bound3)
    bias3 = jax.random.uniform(k_b2, (1,), jnp.float32, minval=-bound3, maxval=bound3)
    x3 = jax.random.normal(k_x3, (200, d3), jnp.float32)
    out3 = jax.block_until_ready(edge_classifier(x3, weight3, bias3))
    ref3 = reference(x3, weight3, bias3)
    assert out3.shape == (200, 1)
    assert jnp.allclose(out3, ref3, atol=1e-5, rtol=1e-5)

    print("KERNEL_OK")
</pallas_src>

<mosaic_0001>
module attributes {stable_mosaic.version = 11 : i64} {
  func.func @_edge_classifier_kernel(%arg0: i32, %arg1: memref<16x128xf32, #tpu.memory_space<vmem>>, %arg2: memref<128x4xf32, #tpu.memory_space<vmem>>, %arg3: memref<1xf32, #tpu.memory_space<smem>>, %arg4: memref<16x4xf32, #tpu.memory_space<vmem>>) attributes {dimension_semantics = [#tpu.dimension_semantics<parallel>], iteration_bounds = array<i64: 1>, scalar_prefetch = 0 : i64, scratch_operands = 0 : i64, tpu.core_type = #tpu.core_type<tc>, window_params = [{transform_indices = @transform_0, window_bounds = array<i64: 16, 128>}, {pipeline_mode = #tpu.pipeline_mode<synchronous>, transform_indices = @transform_1, window_bounds = array<i64: 128, 4>}, {transform_indices = @transform_2, window_bounds = array<i64: 1>}, {transform_indices = @transform_3, window_bounds = array<i64: 16, 4>}]} {
    %c0 = arith.constant 0 : index
    %c0_0 = arith.constant 0 : index
    %0 = vector.load %arg1[%c0, %c0_0] : memref<16x128xf32, #tpu.memory_space<vmem>>, vector<16x128xf32>
    %c0_1 = arith.constant 0 : index
    %c0_2 = arith.constant 0 : index
    %1 = vector.load %arg2[%c0_1, %c0_2] : memref<128x4xf32, #tpu.memory_space<vmem>>, vector<128x4xf32>
    %cst = arith.constant dense<0.000000e+00> : vector<16x4xf32>
    %2 = tpu.matmul %0, %1, %cst {dimension_numbers = #tpu.dot_dimension_numbers<[1], [0], [0], [1], [0, 0, 1, 1], [], []>} : vector<16x128xf32>, vector<128x4xf32>, vector<16x4xf32> -> vector<16x4xf32>
    %c0_3 = arith.constant 0 : index
    %3 = memref.load %arg3[%c0_3] : memref<1xf32, #tpu.memory_space<smem>>
    %4 = vector.broadcast %3 : f32 to vector<16x4xf32>
    %5 = arith.addf %2, %4 : vector<16x4xf32>
    %6 = arith.negf %5 : vector<16x4xf32>
    %7 = math.exp %6 : vector<16x4xf32>
    %cst_4 = arith.constant 1.000000e+00 : f32
    %8 = vector.broadcast %cst_4 : f32 to vector<16x4xf32>
    %9 = arith.addf %8, %7 : vector<16x4xf32>
    %10 = arith.divf %8, %9 : vector<16x4xf32>
    %c0_5 = arith.constant 0 : index
    %c0_6 = arith.constant 0 : index
    %11 = vector.load %arg4[%c0_5, %c0_6] : memref<16x4xf32, #tpu.memory_space<vmem>>, vector<16x4xf32>
    tpu.vector_store %arg4[%c0_5, %c0_6], %10 {strides = array<i32>} : memref<16x4xf32, #tpu.memory_space<vmem>>, vector<16x4xf32>,
    return
  }
  func.func @transform_0(%arg0: i32) -> (i32, i32) {
    %c0_i32 = arith.constant 0 : i32
    %c0_i32_0 = arith.constant 0 : i32
    return %arg0, %c0_i32 : i32, i32
  }
  func.func @transform_1(%arg0: i32) -> (i32, i32) {
    %c0_i32 = arith.constant 0 : i32
    %c0_i32_0 = arith.constant 0 : i32
    %c0_i32_1 = arith.constant 0 : i32
    return %c0_i32, %c0_i32_0 : i32, i32
  }
  func.func @transform_2(%arg0: i32) -> i32 {
    %c0_i32 = arith.constant 0 : i32
    %c0_i32_0 = arith.constant 0 : i32
    return %c0_i32 : i32
  }
  func.func @transform_3(%arg0: i32) -> (i32, i32) {
    %c0_i32 = arith.constant 0 : i32
    %c0_i32_0 = arith.constant 0 : i32
    return %arg0, %c0_i32 : i32, i32
  }
}

</mosaic_0001>

<bundles_post_ra>
// kernel: tpu_custom_call.1
= control target key start
LH: loop header
LB: loop body
LE: loop exit
PB: predicated region body
PF: predicated region fallthrough
CT: control target
= control target key end

     0   :  { %vm122_vm0 = vcmask 31744   ;;  %s307_s1 = inlined_call_operand.vmem [shape: f32[128,4], index: 1, kind: input, shape index: {}]   ;;  %s308_s0 = inlined_call_operand.vmem [shape: f32[16,128], index: 0, kind: input, shape index: {}]   ;;  %s309_s2 = inlined_call_operand.<no memory space> [shape: f32[1], index: 2, kind: input, shape index: {}]   ;;  %s310_s3 = inlined_call_operand.vmem [shape: f32[16,4], index: 3, kind: output, shape index: {}]  }
   0x1   :  { %v17_v0 = vld [vmem:[%s307_s1] sm:$0xff]  ;;  %v18_v1 = vld [vmem:[%s307_s1 + $0x8] sm:$0xff]  ;;  %v19_v2 = vld [vmem:[%s307_s1 + $0x10] sm:$0xff]  ;;  %v34_v26 = vstv %s309_s2 }
   0x2   :  { %v184_v3 = vpack.c.bf16 %v18_v1, %v17_v0  ;;  %v20_v4 = vld [vmem:[%s307_s1 + $0x18] sm:$0xff]  ;;  %v21_v6 = vld [vmem:[%s307_s1 + $0x20] sm:$0xff]  ;;  %v22_v7 = vld [vmem:[%s307_s1 + $0x28] sm:$0xff] }
   0x3   :  { %v188_v5 = vpack.c.bf16 %v20_v4, %v19_v2  ;;  %v192_v8 = vpack.c.bf16 %v22_v7, %v21_v6  ;;  %v15_v9 = vld [vmem:[%s308_s0] sm:$0xff]  ;;  %v23_v10 = vld [vmem:[%s307_s1 + $0x30] sm:$0xff]  ;;  %v24_v11 = vld [vmem:[%s307_s1 + $0x38] sm:$0xff] }
   0x4   :  { %185 = vmatprep.subr.bf16.mxu0 %v184_v3  ;;  %181 = vmatprep.mubr.f32.mxu0 %v15_v9  ;;  %v196_v12 = vpack.c.bf16 %v24_v11, %v23_v10  ;;  %v25_v13 = vld [vmem:[%s307_s1 + $0x40] sm:$0xff]  ;;  %v26_v14 = vld [vmem:[%s307_s1 + $0x48] sm:$0xff]  ;;  %v27_v16 = vld [vmem:[%s307_s1 + $0x50] sm:$0xff] }
   0x5   :  { %187 = vmatpush3.bf16.msra.mxu0 %v184_v3  ;;  %v200_v15 = vpack.c.bf16 %v26_v14, %v25_v13  ;;  %v28_v17 = vld [vmem:[%s307_s1 + $0x58] sm:$0xff]  ;;  %v29_v19 = vld [vmem:[%s307_s1 + $0x60] sm:$0xff]  ;;  %v30_v20 = vld [vmem:[%s307_s1 + $0x68] sm:$0xff] }
   0x6   :  { %189 = vmatprep.subr.bf16.mxu0 %v188_v5  ;;  %v204_v18 = vpack.c.bf16 %v28_v17, %v27_v16  ;;  %v208_v21 = vpack.c.bf16 %v30_v20, %v29_v19  ;;  %v31_v22 = vld [vmem:[%s307_s1 + $0x70] sm:$0xff]  ;;  %v32_v23 = vld [vmem:[%s307_s1 + $0x78] sm:$0xff]  ;;  %v16_v25 = vld [vmem:[%s308_s0 + $0x8] sm:$0xff] }
   0x7   :  { %v212_v24 = vpack.c.bf16 %v32_v23, %v31_v22 }
   0x9   :  { %191 = vmatpush3.bf16.msra.mxu0 %v188_v5 }
   0xa   :  { %193 = vmatprep.subr.bf16.mxu0 %v192_v8 }
   0xd   :  { %195 = vmatpush3.bf16.msra.mxu0 %v192_v8 }
   0xe   :  { %197 = vmatprep.subr.bf16.mxu0 %v196_v12 }
  0x11   :  { %199 = vmatpush3.bf16.msra.mxu0 %v196_v12 }
  0x12   :  { %201 = vmatprep.subr.bf16.mxu0 %v200_v15 }
  0x15   :  { %203 = vmatpush3.bf16.msra.mxu0 %v200_v15 }
  0x16   :  { %205 = vmatprep.subr.bf16.mxu0 %v204_v18 }
  0x19   :  { %207 = vmatpush3.bf16.msra.mxu0 %v204_v18 }
  0x1a   :  { %209 = vmatprep.subr.bf16.mxu0 %v208_v21 }
  0x1d   :  { %211 = vmatpush3.bf16.msra.mxu0 %v208_v21 }
  0x1e   :  { %213 = vmatprep.subr.bf16.mxu0 %v212_v24 }
  0x21   :  { %215 = vmatpush3.bf16.msra.mxu0 %v212_v24 }
  0x24   :  { %182 = vmatmul.mubr.f32.vlgmr.msra.gmra.mrb[0].mxu0 %v16_v25 }
  0xf7   :  { %v183_v27 = vpop.f32.mrb[0].mxu0 }
  0xf8   :  { %v107_v28 = vadd.f32 %v183_v27, %v34_v26  ;;  %v101_v29 = vpop.f32.mrb[1].mxu0 }
  0xf9   :  { %v102_v30 = vadd.f32 %v101_v29, %v34_v26 }
  0xfa   :  { %v130_v31 = vmul.f32 -1.442695, %v107_v28 }
  0xfb   :  { %v129_v32 = vmul.f32 -1.442695, %v102_v30 }
  0xfc   :  { %216 = vpow2.f32 %v130_v31 }
  0xfd   :  { %218 = vpow2.f32 %v129_v32 }
 0x106   :  { %v217_v33 = vpop.eup %216 }
 0x107   :  { %v219_v34 = vpop.eup %218  ;;  %v117_v35 = vadd.f32 1.0, %v217_v33 }
 0x108   :  { %v116_v36 = vadd.f32 1.0, %v219_v34 }
 0x109   :  { %220 = vrcp.f32 %v117_v35 }
 0x10a   :  { %222 = vrcp.f32 %v116_v36 }
 0x113   :  { %v221_v37 = vpop.eup %220 }
 0x114   :  { %v223_v38 = vpop.eup %222  ;;  %124 = vst.msk [vmem:[%s310_s3 + $0x8] sm:$0xff] %vm122_vm0, %v221_v37 }
 0x115   :  { %123 = vst.msk [vmem:[%s310_s3] sm:$0xff] %vm122_vm0, %v223_v38 }

</bundles_post_ra>
